<compile_context>
chip_gen: v7x
topology: tpu7x:2x2x1
jax: 0.10.0
libtpu: 0.0.40
codegen_flags: <defaults>
</compile_context>

<pallas_src>
import jax
import jax.numpy as jnp
from jax.experimental import pallas as pl
from jax.experimental.pallas import tpu as pltpu

_LANE = 128      # lane width (last dim)
_SUBLANE = 8     # sublane width (second-to-last dim)


def _round_up(n, m):
    return ((n + m - 1) // m) * m


# ---------------------------------------------------------------------------
# Kernel: one grid step == one RNN time step.
# ---------------------------------------------------------------------------
def rnn_seq_kernel(leak_ref, jin_t_ref, jrec_t_ref, jout_t_ref,
                   x_ref, h0_ref, out_ref, htr_ref, h_scratch):
    """Shapes inside the kernel (all padded: Bp % 8 == 0, Ip/Hp/Op % 128 == 0):

      leak_ref   : SMEM (1,)         = 1 - dt
      jin_t_ref  : VMEM (Ip, Hp)     = (dt * Jin)^T     (resident across steps)
      jrec_t_ref : VMEM (Hp, Hp)     = (dt * Jrec)^T    (resident across steps)
      jout_t_ref : VMEM (Hp, Op)     = Jout^T           (resident across steps)
      x_ref      : VMEM (1, Bp, Ip)  input block of the current time step
      h0_ref     : VMEM (Bp, Hp)     initial hidden (read only at t == 0)
      out_ref    : VMEM (1, Bp, Op)  per-step raw output (pre-tanh, as forward())
      htr_ref    : VMEM (1, Bp, Hp)  per-step hidden state
      h_scratch  : VMEM (Bp, Hp)     running hidden state across grid steps
    """
    t = pl.program_id(0)

    @pl.when(t == 0)
    def _():
        h_scratch[...] = h0_ref[...]

    leak = leak_ref[0]                      # scalar (1 - dt)
    h = h_scratch[...]                      # (Bp, Hp)
    x = x_ref[0]                            # (Bp, Ip)

    # dt is pre-folded into the transposed weights.
    in_term = jnp.dot(x, jin_t_ref[...], preferred_element_type=jnp.float32)
    rec_term = jnp.dot(1.0 + jnp.tanh(h), jrec_t_ref[...],
                       preferred_element_type=jnp.float32)
    h_next = in_term + rec_term + leak * h

    h_scratch[...] = h_next
    htr_ref[0] = h_next
    out_ref[0] = jnp.dot(jnp.tanh(h_next), jout_t_ref[...],
                         preferred_element_type=jnp.float32)


# ---------------------------------------------------------------------------
# Host-side wrappers
# ---------------------------------------------------------------------------
def prepare_rnn_params(Jin, Jrec, Jout, dt):
    """One-time preprocessing: cast f32, transpose, fold dt, zero-pad."""
    Jin = jnp.asarray(Jin, jnp.float32)
    Jrec = jnp.asarray(Jrec, jnp.float32)
    Jout = jnp.asarray(Jout, jnp.float32)
    H, I = Jin.shape
    O = Jout.shape[0]
    Ip, Hp, Op = (_round_up(d, _LANE) for d in (I, H, O))

    jin_t = jnp.zeros((Ip, Hp), jnp.float32).at[:I, :H].set((dt * Jin).T)
    jrec_t = jnp.zeros((Hp, Hp), jnp.float32).at[:H, :H].set((dt * Jrec).T)
    jout_t = jnp.zeros((Hp, Op), jnp.float32).at[:H, :O].set(Jout.T)
    leak = jnp.asarray([1.0 - dt], jnp.float32)
    return dict(jin_t=jin_t, jrec_t=jrec_t, jout_t=jout_t, leak=leak,
                dims=(I, H, O), pdims=(Ip, Hp, Op))


@jax.jit
def _rnn_rollout_padded(leak, jin_t, jrec_t, jout_t, x_pad, h0_pad):
    """Run the whole padded sequence in a single pallas_call."""
    T, Bp, Ip = x_pad.shape
    Hp = jrec_t.shape[0]
    Op = jout_t.shape[1]

    grid_spec = pltpu.PrefetchScalarGridSpec(
        num_scalar_prefetch=0,
        grid=(T,),
        in_specs=[
            pl.BlockSpec(memory_space=pltpu.MemorySpace.SMEM),   # leak scalar
            pl.BlockSpec((Ip, Hp), lambda t: (0, 0)),            # (dt*Jin)^T  resident
            pl.BlockSpec((Hp, Hp), lambda t: (0, 0)),            # (dt*Jrec)^T resident
            pl.BlockSpec((Hp, Op), lambda t: (0, 0)),            # Jout^T      resident
            pl.BlockSpec((1, Bp, Ip), lambda t: (t, 0, 0)),      # x_t
            pl.BlockSpec((Bp, Hp), lambda t: (0, 0)),            # h0          resident
        ],
        out_specs=[
            pl.BlockSpec((1, Bp, Op), lambda t: (t, 0, 0)),      # per-step output
            pl.BlockSpec((1, Bp, Hp), lambda t: (t, 0, 0)),      # per-step hidden
        ],
        scratch_shapes=[pltpu.VMEM((Bp, Hp), jnp.float32)],      # running hidden
    )

    out_pad, htr_pad = pl.pallas_call(
        rnn_seq_kernel,
        out_shape=(
            jax.ShapeDtypeStruct((T, Bp, Op), jnp.float32),
            jax.ShapeDtypeStruct((T, Bp, Hp), jnp.float32),
        ),
        grid_spec=grid_spec,
        compiler_params=pltpu.CompilerParams(
            dimension_semantics=("arbitrary",),   # time recurrence is sequential
        ),
    )(leak, jin_t, jrec_t, jout_t, x_pad, h0_pad)
    return out_pad, htr_pad


def rnn_feed(Jin, Jrec, Jout, inpt_seq, hidden0, dt):
    """Fused equivalent of the RNN.feed time loop (without the output tanh).

    inpt_seq: (T, I)-reshapeable sequence   hidden0: (H, 1) or (H,)
    Returns (outputs (T, O, 1), hidden_trace (T, H, 1)).
    """
    params = prepare_rnn_params(Jin, Jrec, Jout, dt)
    I, H, O = params["dims"]
    Ip, Hp, Op = params["pdims"]

    x = jnp.asarray(inpt_seq, jnp.float32).reshape(-1, I)
    T = x.shape[0]
    Bp = _SUBLANE
    x_pad = jnp.zeros((T, Bp, Ip), jnp.float32).at[:, 0, :I].set(x)
    h0 = jnp.asarray(hidden0, jnp.float32).reshape(H)
    h0_pad = jnp.zeros((Bp, Hp), jnp.float32).at[0, :H].set(h0)

    out_pad, htr_pad = _rnn_rollout_padded(params["leak"], params["jin_t"],
                                           params["jrec_t"], params["jout_t"],
                                           x_pad, h0_pad)
    outputs = out_pad[:, 0, :O].reshape(T, O, 1)
    hidden_trace = htr_pad[:, 0, :H].reshape(T, H, 1)
    return outputs, hidden_trace


def rnn_forward(Jin, Jrec, Jout, inpt, hidden, dt):
    """Single-step equivalent of RNN.forward -> (output (O,1), hidden_next (H,1))."""
    I = jnp.asarray(Jin).shape[1]
    x = jnp.asarray(inpt, jnp.float32).reshape(1, I)
    outputs, hidden_trace = rnn_feed(Jin, Jrec, Jout, x, hidden, dt)
    return outputs[0], hidden_trace[0]


def rnn_forward_ref(Jin, Jrec, Jout, inpt, hidden, dt):
    """Pure-JAX reference mirroring the PyTorch code."""
    Jin = jnp.asarray(Jin, jnp.float32)
    Jrec = jnp.asarray(Jrec, jnp.float32)
    Jout = jnp.asarray(Jout, jnp.float32)
    x = jnp.asarray(inpt, jnp.float32).reshape(Jin.shape[1], 1)
    h = jnp.asarray(hidden, jnp.float32).reshape(-1, 1)
    h_next = dt * Jin @ x + dt * Jrec @ (1.0 + jnp.tanh(h)) + (1.0 - dt) * h
    out = Jout @ jnp.tanh(h_next)
    return out, h_next


if __name__ == "__main__":
    input_size, hidden_size, output_size = 16, 32, 8
    var, dt, T = 0.045, 0.1, 8

    key = jax.random.PRNGKey(0)
    k_in, k_rec, k_out, k_h, k_x = jax.random.split(key, 5)

    # Deterministic parameter init mirroring the module's __init__:
    Jin = (jax.random.uniform(k_in, (hidden_size, input_size)) - 0.5) * 2.0
    Jrec = var * jax.random.normal(k_rec, (hidden_size, hidden_size))
    Jout = (jax.random.uniform(k_out, (output_size, hidden_size)) - 0.5) * 2.0
    # init_hidden(): 2 * (rand(H,1) - 0.5)
    hidden0 = 2.0 * (jax.random.uniform(k_h, (hidden_size, 1)) - 0.5)
    inpt_seq = jax.random.normal(k_x, (T, input_size))

    # --- single-step forward (matches RNN.forward) -------------------------
    out1, h1 = rnn_forward(Jin, Jrec, Jout, inpt_seq[0], hidden0, dt)
    out1 = jax.block_until_ready(out1)
    h1 = jax.block_until_ready(h1)
    out1_ref, h1_ref = rnn_forward_ref(Jin, Jrec, Jout, inpt_seq[0], hidden0, dt)
    assert out1.shape == (output_size, 1) and h1.shape == (hidden_size, 1)
    assert jnp.allclose(out1, out1_ref, atol=1e-5, rtol=1e-5)
    assert jnp.allclose(h1, h1_ref, atol=1e-5, rtol=1e-5)

    # --- fused multi-step rollout (RNN.feed loop inside ONE pallas_call) ---
    outs, htrace = rnn_feed(Jin, Jrec, Jout, inpt_seq, hidden0, dt)
    outs = jax.block_until_ready(outs)
    htrace = jax.block_until_ready(htrace)

    h_ref = hidden0
    for t in range(T):
        o_ref, h_ref = rnn_forward_ref(Jin, Jrec, Jout, inpt_seq[t], h_ref, dt)
        assert jnp.allclose(outs[t], o_ref, atol=1e-4, rtol=1e-4)
        assert jnp.allclose(htrace[t], h_ref, atol=1e-4, rtol=1e-4)

    print("KERNEL_OK")
</pallas_src>

<mosaic_0001>
module attributes {stable_mosaic.version = 11 : i64} {
  func.func @rnn_seq_kernel(%arg0: i32, %arg1: memref<1xf32, #tpu.memory_space<smem>>, %arg2: memref<128x128xf32, #tpu.memory_space<vmem>>, %arg3: memref<128x128xf32, #tpu.memory_space<vmem>>, %arg4: memref<128x128xf32, #tpu.memory_space<vmem>>, %arg5: memref<1x8x128xf32, #tpu.memory_space<vmem>>, %arg6: memref<8x128xf32, #tpu.memory_space<vmem>>, %arg7: memref<1x8x128xf32, #tpu.memory_space<vmem>>, %arg8: memref<1x8x128xf32, #tpu.memory_space<vmem>>, %arg9: memref<8x128xf32, #tpu.memory_space<vmem>>) attributes {dimension_semantics = [#tpu.dimension_semantics<arbitrary>], iteration_bounds = array<i64: 1>, scalar_prefetch = 0 : i64, scratch_operands = 1 : i64, tpu.core_type = #tpu.core_type<tc>, window_params = [{transform_indices = @transform_0, window_bounds = array<i64: 1>}, {pipeline_mode = #tpu.pipeline_mode<synchronous>, transform_indices = @transform_1, window_bounds = array<i64: 128, 128>}, {pipeline_mode = #tpu.pipeline_mode<synchronous>, transform_indices = @transform_2, window_bounds = array<i64: 128, 128>}, {pipeline_mode = #tpu.pipeline_mode<synchronous>, transform_indices = @transform_3, window_bounds = array<i64: 128, 128>}, {transform_indices = @transform_4, window_bounds = array<i64: 1, 8, 128>}, {pipeline_mode = #tpu.pipeline_mode<synchronous>, transform_indices = @transform_5, window_bounds = array<i64: 8, 128>}, {transform_indices = @transform_6, window_bounds = array<i64: 1, 8, 128>}, {transform_indices = @transform_7, window_bounds = array<i64: 1, 8, 128>}]} {
    %c0_i32 = arith.constant 0 : i32
    %0 = arith.cmpi eq, %arg0, %c0_i32 : i32
    %1 = arith.extui %0 : i1 to i32
    %c0_i32_0 = arith.constant 0 : i32
    %2 = arith.cmpi ne, %1, %c0_i32_0 : i32
    scf.if %2 {
      %c0_23 = arith.constant 0 : index
      %c0_24 = arith.constant 0 : index
      %28 = vector.load %arg6[%c0_23, %c0_24] : memref<8x128xf32, #tpu.memory_space<vmem>>, vector<8x128xf32>
      %c0_25 = arith.constant 0 : index
      %c0_26 = arith.constant 0 : index
      %29 = vector.load %arg9[%c0_25, %c0_26] : memref<8x128xf32, #tpu.memory_space<vmem>>, vector<8x128xf32>
      tpu.vector_store %arg9[%c0_25, %c0_26], %28 {strides = array<i32>} : memref<8x128xf32, #tpu.memory_space<vmem>>, vector<8x128xf32>,
    } else {
    }
    %c0 = arith.constant 0 : index
    %3 = memref.load %arg1[%c0] : memref<1xf32, #tpu.memory_space<smem>>
    %c0_1 = arith.constant 0 : index
    %c0_2 = arith.constant 0 : index
    %4 = vector.load %arg9[%c0_1, %c0_2] : memref<8x128xf32, #tpu.memory_space<vmem>>, vector<8x128xf32>
    %c0_3 = arith.constant 0 : index
    %c0_4 = arith.constant 0 : index
    %c0_5 = arith.constant 0 : index
    %5 = vector.load %arg5[%c0_3, %c0_4, %c0_5] : memref<1x8x128xf32, #tpu.memory_space<vmem>>, vector<1x8x128xf32>
    %6 = vector.shape_cast %5 : vector<1x8x128xf32> to vector<8x128xf32>
    %c0_6 = arith.constant 0 : index
    %c0_7 = arith.constant 0 : index
    %7 = vector.load %arg2[%c0_6, %c0_7] : memref<128x128xf32, #tpu.memory_space<vmem>>, vector<128x128xf32>
    %cst = arith.constant dense<0.000000e+00> : vector<8x128xf32>
    %8 = tpu.matmul %6, %7, %cst {dimension_numbers = #tpu.dot_dimension_numbers<[1], [0], [0], [1], [0, 0, 1, 1], [], []>} : vector<8x128xf32>, vector<128x128xf32>, vector<8x128xf32> -> vector<8x128xf32>
    %9 = math.tanh %4 : vector<8x128xf32>
    %cst_8 = arith.constant 1.000000e+00 : f32
    %10 = vector.broadcast %cst_8 : f32 to vector<8x128xf32>
    %11 = arith.addf %10, %9 : vector<8x128xf32>
    %c0_9 = arith.constant 0 : index
    %c0_10 = arith.constant 0 : index
    %12 = vector.load %arg3[%c0_9, %c0_10] : memref<128x128xf32, #tpu.memory_space<vmem>>, vector<128x128xf32>
    %cst_11 = arith.constant dense<0.000000e+00> : vector<8x128xf32>
    %13 = tpu.matmul %11, %12, %cst_11 {dimension_numbers = #tpu.dot_dimension_numbers<[1], [0], [0], [1], [0, 0, 1, 1], [], []>} : vector<8x128xf32>, vector<128x128xf32>, vector<8x128xf32> -> vector<8x128xf32>
    %14 = arith.addf %8, %13 : vector<8x128xf32>
    %15 = vector.broadcast %3 : f32 to vector<8x128xf32>
    %16 = arith.mulf %15, %4 : vector<8x128xf32>
    %17 = arith.addf %14, %16 : vector<8x128xf32>
    %c0_12 = arith.constant 0 : index
    %c0_13 = arith.constant 0 : index
    %18 = vector.load %arg9[%c0_12, %c0_13] : memref<8x128xf32, #tpu.memory_space<vmem>>, vector<8x128xf32>
    tpu.vector_store %arg9[%c0_12, %c0_13], %17 {strides = array<i32>} : memref<8x128xf32, #tpu.memory_space<vmem>>, vector<8x128xf32>,
    %c0_14 = arith.constant 0 : index
    %c0_15 = arith.constant 0 : index
    %c0_16 = arith.constant 0 : index
    %19 = vector.load %arg8[%c0_14, %c0_15, %c0_16] : memref<1x8x128xf32, #tpu.memory_space<vmem>>, vector<1x8x128xf32>
    %20 = vector.shape_cast %19 : vector<1x8x128xf32> to vector<8x128xf32>
    %21 = vector.shape_cast %17 : vector<8x128xf32> to vector<1x8x128xf32>
    tpu.vector_store %arg8[%c0_14, %c0_15, %c0_16], %21 {strides = array<i32>} : memref<1x8x128xf32, #tpu.memory_space<vmem>>, vector<1x8x128xf32>,
    %22 = math.tanh %17 : vector<8x128xf32>
    %c0_17 = arith.constant 0 : index
    %c0_18 = arith.constant 0 : index
    %23 = vector.load %arg4[%c0_17, %c0_18] : memref<128x128xf32, #tpu.memory_space<vmem>>, vector<128x128xf32>
    %cst_19 = arith.constant dense<0.000000e+00> : vector<8x128xf32>
    %24 = tpu.matmul %22, %23, %cst_19 {dimension_numbers = #tpu.dot_dimension_numbers<[1], [0], [0], [1], [0, 0, 1, 1], [], []>} : vector<8x128xf32>, vector<128x128xf32>, vector<8x128xf32> -> vector<8x128xf32>
    %c0_20 = arith.constant 0 : index
    %c0_21 = arith.constant 0 : index
    %c0_22 = arith.constant 0 : index
    %25 = vector.load %arg7[%c0_20, %c0_21, %c0_22] : memref<1x8x128xf32, #tpu.memory_space<vmem>>, vector<1x8x128xf32>
    %26 = vector.shape_cast %25 : vector<1x8x128xf32> to vector<8x128xf32>
    %27 = vector.shape_cast %24 : vector<8x128xf32> to vector<1x8x128xf32>
    tpu.vector_store %arg7[%c0_20, %c0_21, %c0_22], %27 {strides = array<i32>} : memref<1x8x128xf32, #tpu.memory_space<vmem>>, vector<1x8x128xf32>,
    return
  }
  func.func @transform_0(%arg0: i32) -> i32 {
    %c0_i32 = arith.constant 0 : i32
    %c0_i32_0 = arith.constant 0 : i32
    return %c0_i32 : i32
  }
  func.func @transform_1(%arg0: i32) -> (i32, i32) {
    %c0_i32 = arith.constant 0 : i32
    %c0_i32_0 = arith.constant 0 : i32
    %c0_i32_1 = arith.constant 0 : i32
    return %c0_i32, %c0_i32_0 : i32, i32
  }
  func.func @transform_2(%arg0: i32) -> (i32, i32) {
    %c0_i32 = arith.constant 0 : i32
    %c0_i32_0 = arith.constant 0 : i32
    %c0_i32_1 = arith.constant 0 : i32
    return %c0_i32, %c0_i32_0 : i32, i32
  }
  func.func @transform_3(%arg0: i32) -> (i32, i32) {
    %c0_i32 = arith.constant 0 : i32
    %c0_i32_0 = arith.constant 0 : i32
    %c0_i32_1 = arith.constant 0 : i32
    return %c0_i32, %c0_i32_0 : i32, i32
  }
  func.func @transform_4(%arg0: i32) -> (i32, i32, i32) {
    %c0_i32 = arith.constant 0 : i32
    %c0_i32_0 = arith.constant 0 : i32
    %c0_i32_1 = arith.constant 0 : i32
    return %arg0, %c0_i32, %c0_i32_0 : i32, i32, i32
  }
  func.func @transform_5(%arg0: i32) -> (i32, i32) {
    %c0_i32 = arith.constant 0 : i32
    %c0_i32_0 = arith.constant 0 : i32
    %c0_i32_1 = arith.constant 0 : i32
    return %c0_i32, %c0_i32_0 : i32, i32
  }
  func.func @transform_6(%arg0: i32) -> (i32, i32, i32) {
    %c0_i32 = arith.constant 0 : i32
    %c0_i32_0 = arith.constant 0 : i32
    %c0_i32_1 = arith.constant 0 : i32
    return %arg0, %c0_i32, %c0_i32_0 : i32, i32, i32
  }
  func.func @transform_7(%arg0: i32) -> (i32, i32, i32) {
    %c0_i32 = arith.constant 0 : i32
    %c0_i32_0 = arith.constant 0 : i32
    %c0_i32_1 = arith.constant 0 : i32
    return %arg0, %c0_i32, %c0_i32_0 : i32, i32, i32
  }
}

</mosaic_0001>

<bundles_post_ra>
// kernel: _rnn_rollout_padded.1
= control target key start
LH: loop header
LB: loop body
LE: loop exit
PB: predicated region body
PF: predicated region fallthrough
CT: control target
= control target key end

     0   :  { %14 = vsyncpa [#allocation5], 0  ;;  %s904_s0 = inlined_call_operand.<no memory space> [shape: f32[1], index: 0, kind: input, shape index: {}]   ;;  %s905_s1 = inlined_call_operand.hbm [shape: f32[128,128], index: 1, kind: input, shape index: {}]   ;;  %s906_s2 = inlined_call_operand.hbm [shape: f32[128,128], index: 2, kind: input, shape index: {}]   ;;  %s907_s3 = inlined_call_operand.hbm [shape: f32[128,128], index: 3, kind: input, shape index: {}]   ;;  %s908_s4 = inlined_call_operand.vmem [shape: f32[1,8,128], index: 4, kind: input, shape index: {}]   ;;  %s909_s5 = inlined_call_operand.vmem [shape: f32[8,128], index: 5, kind: input, shape index: {}]   ;;  %s910_s6 = inlined_call_operand.hbm [shape: f32[1,8,128], index: 6, kind: output, shape index: {0}]   ;;  %s911_s7 = inlined_call_operand.hbm [shape: f32[1,8,128], index: 7, kind: output, shape index: {1}]  }
   0x1   :  { %15 = vsyncpa [#allocation8], 0 }
   0x2   :  { %16 = vsyncpa [#allocation6], 0 }
   0x3   :  { %17 = vsyncpa [#allocation12], 0  ;;  %s735_s24 = smov [#allocation7]   ;;  %s736_s26 = smov [#allocation4]  }
   0x4   :  { %s37_s25 = sshll.u32 %s735_s24, 4  ;;  %s25_s27 = sshll.u32 %s736_s26, 4  ;;  %s38_s25 = int_to_ptr.vmem [resolvable:$true] %s37_s25  ;;  %s785_s27 = int_to_ptr.vmem [resolvable:$true] %s25_s27 }
   0x5   :  { %s617_s30 = scalar_lea.hbm %s906_s2, 2048 }
   0x6   :  { %p618_p0 = scmp.ne.s32.totalorder %s906_s2, %s617_s30  ;;  %p621_p1 = scmp.lt.u32.totalorder %s617_s30, %s906_s2 }
   0x8   :  { %p623_p2 = pnand %p621_p1, %p618_p0 }
   0xa   :  { %626 = shalt.err (!%p623_p2)
}
   0xb   :  { %s627_s12 = scalar_lea.vmem %s38_s25, 2048  ;;  %p632_p4 = scmp.lt.s32.totalorder %s38_s25, %s38_s25 }
   0xc   :  { %p628_p3 = scmp.ne.s32.totalorder %s38_s25, %s627_s12  ;;  %p633_p5 = scmp.lt.s32.totalorder %s627_s12, %s627_s12 }
   0xe   :  { %p634_p6 = por %p633_p5, %p632_p4 }
  0x10   :  { %p635_p7 = pnand %p634_p6, %p628_p3 }
  0x12   :  { %638 = shalt.err (!%p635_p7)
}
  0x13   :  { %s737_s13 = smov 128   ;;  %s738_s14 = smov 8  }
  0x14   :  { %43 = dma.hbm_to_vmem [thread:$0]  %s906_s2, 2048, %s38_s25, [#allocation8], %s737_s13, %s737_s13, %s738_s14  }
  0x15   :  { %s639_s19 = scalar_lea.hbm %s905_s1, 2048 }
  0x16   :  { %p640_p8 = scmp.ne.s32.totalorder %s905_s1, %s639_s19  ;;  %p643_p9 = scmp.lt.u32.totalorder %s639_s19, %s905_s1 }
  0x18   :  { %p645_p10 = pnand %p643_p9, %p640_p8 }
  0x1a   :  { %648 = shalt.err (!%p645_p10)
}
  0x1b   :  { %s649_s24 = scalar_lea.vmem %s785_s27, 2048  ;;  %p654_p12 = scmp.lt.s32.totalorder %s785_s27, %s785_s27 }
  0x1c   :  { %p650_p11 = scmp.ne.s32.totalorder %s785_s27, %s649_s24  ;;  %p655_p13 = scmp.lt.s32.totalorder %s649_s24, %s649_s24 }
  0x1e   :  { %p656_p0 = por %p655_p13, %p654_p12 }
  0x20   :  { %p657_p1 = pnand %p656_p0, %p650_p11 }
  0x22   :  { %660 = shalt.err (!%p657_p1)
}
  0x23   :  { %31 = dma.hbm_to_vmem [thread:$0]  %s905_s1, 2048, %s785_s27, [#allocation5], %s737_s13, %s737_s13, %s738_s14  }
  0x24   :  { %s739_s26 = smov [#allocation9]   ;;  %s661_s8 = scalar_lea.hbm %s907_s3, 2048 }
  0x25   :  { %s49_s28 = sshll.u32 %s739_s26, 4  ;;  %p662_p2 = scmp.ne.s32.totalorder %s907_s3, %s661_s8  ;;  %s50_s28 = int_to_ptr.vmem [resolvable:$true] %s49_s28 }
  0x26   :  { %p665_p3 = scmp.lt.u32.totalorder %s661_s8, %s907_s3 }
  0x28   :  { %p667_p4 = pnand %p665_p3, %p662_p2 }
  0x2a   :  { %670 = shalt.err (!%p667_p4)
}
  0x2b   :  { %s671_s15 = scalar_lea.vmem %s50_s28, 2048  ;;  %p676_p6 = scmp.lt.s32.totalorder %s50_s28, %s50_s28 }
  0x2c   :  { %p672_p5 = scmp.ne.s32.totalorder %s50_s28, %s671_s15  ;;  %p677_p7 = scmp.lt.s32.totalorder %s671_s15, %s671_s15 }
  0x2e   :  { %p678_p8 = por %p677_p7, %p676_p6 }
  0x30   :  { %p679_p9 = pnand %p678_p8, %p672_p5 }
  0x32   :  { %682 = shalt.err (!%p679_p9)
}
  0x33   :  { %55 = dma.hbm_to_vmem [thread:$0]  %s907_s3, 2048, %s50_s28, [#allocation8], %s737_s13, %s737_s13, %s738_s14  }
  0x34   :  { %727 = dma.done.wait [#allocation5], 2048  }
  0x35   :  { %728 = vsyncadd [#allocation5], 4294965248 }
  0x36   :  { %729 = dma.done.wait [#allocation8], 4096  }
  0x37   :  { %730 = vsyncadd [#allocation8], 4294963200  ;;  %v740_v0 = vmov 0.0|0.0   ;;  %vm741_vm0 = vmmov 0   ;;  %v742_v1 = vmov 0.0   ;;  %v96_v2 = vld [vmem:[#allocation7] sm:$0xff] }
  0x38   :  { %531 = vmatprep.subr.bf16.mxu0 %v740_v0  ;;  %555 = vmatprep.subr.bf16.mxu1 %v740_v0  ;;  %v97_v3 = vld [vmem:[#allocation7 + $0x8] sm:$0xff]  ;;  %v78_v4 = vld [vmem:[#allocation4] sm:$0xff]  ;;  %v98_v7 = vld [vmem:[#allocation7 + $0x10] sm:$0xff]  ;;  %s743_s17 = smov [#allocation11]  }
  0x39   :  { %458 = vmatprep.mubr.msk.f32.mxu0 %vm741_vm0, %v742_v1  ;;  %493 = vmatprep.mubr.msk.f32.mxu1 %vm741_vm0, %v742_v1  ;;  %v532_v5 = vpack.c.bf16 %v97_v3, %v96_v2  ;;  %v79_v6 = vld [vmem:[#allocation4 + $0x8] sm:$0xff]  ;;  %v99_v8 = vld [vmem:[#allocation7 + $0x18] sm:$0xff]  ;;  %v80_v10 = vld [vmem:[#allocation4 + $0x10] sm:$0xff]  ;;  %s361_s18 = sshll.u32 %s743_s17, 4  ;;  %s362_s18 = int_to_ptr.vmem [resolvable:$true] %s361_s18 }
  0x3a   :  { %v556_v9 = vpack.c.bf16 %v79_v6, %v78_v4  ;;  %v81_v11 = vld [vmem:[#allocation4 + $0x18] sm:$0xff]  ;;  %v535_v12 = vpack.c.bf16 %v99_v8, %v98_v7  ;;  %v100_v14 = vld [vmem:[#allocation7 + $0x20] sm:$0xff]  ;;  %v101_v15 = vld [vmem:[#allocation7 + $0x28] sm:$0xff]  ;;  %s683_s19 = scalar_lea.vmem %s362_s18, 128  ;;  %p688_p11 = scmp.lt.s32.totalorder %s362_s18, %s362_s18 }
  0x3b   :  { %533 = vmatpush3.bf16.msra.mxu0 %v532_v5  ;;  %v559_v13 = vpack.c.bf16 %v81_v11, %v80_v10  ;;  %v82_v16 = vld [vmem:[#allocation4 + $0x20] sm:$0xff]  ;;  %v83_v17 = vld [vmem:[#allocation4 + $0x28] sm:$0xff]  ;;  %v538_v18 = vpack.c.bf16 %v101_v15, %v100_v14  ;;  %v102_v20 = vld [vmem:[#allocation7 + $0x30] sm:$0xff]  ;;  %v252_v15 = vstv %s904_s0  ;;  %p684_p10 = scmp.ne.s32.totalorder %s362_s18, %s683_s19  ;;  %p689_p12 = scmp.lt.s32.totalorder %s683_s19, %s683_s19 }
  0x3c   :  { %557 = vmatpush3.bf16.msra.mxu1 %v556_v9  ;;  %534 = vmatprep.subr.bf16.mxu0 %v740_v0  ;;  %v562_v19 = vpack.c.bf16 %v83_v17, %v82_v16  ;;  %v103_v21 = vld [vmem:[#allocation7 + $0x38] sm:$0xff]  ;;  %v84_v22 = vld [vmem:[#allocation4 + $0x30] sm:$0xff]  ;;  %v104_v26 = vld [vmem:[#allocation7 + $0x40] sm:$0xff] }
  0x3d   :  { %558 = vmatprep.subr.bf16.mxu1 %v740_v0  ;;  %v85_v23 = vld [vmem:[#allocation4 + $0x38] sm:$0xff]  ;;  %v541_v24 = vpack.c.bf16 %v103_v21, %v102_v20  ;;  %v105_v27 = vld [vmem:[#allocation7 + $0x48] sm:$0xff]  ;;  %v86_v28 = vld [vmem:[#allocation4 + $0x40] sm:$0xff]  ;;  %p690_p13 = por %p689_p12, %p688_p11 }
  0x3e   :  { %v565_v25 = vpack.c.bf16 %v85_v23, %v84_v22  ;;  %v87_v29 = vld [vmem:[#allocation4 + $0x48] sm:$0xff]  ;;  %v852_v30 = vld [vmem:[%s909_s5] sm:$0xff]  ;;  %v544_v31 = vpack.c.bf16 %v105_v27, %v104_v26  ;;  %v106_v33 = vld [vmem:[#allocation7 + $0x50] sm:$0xff] }
  0x3f   :  { %536 = vmatpush3.bf16.msra.mxu0 %v535_v12  ;;  %v568_v32 = vpack.c.bf16 %v87_v29, %v86_v28  ;;  %v107_v34 = vld [vmem:[#allocation7 + $0x58] sm:$0xff]  ;;  %v88_v35 = vld [vmem:[#allocation4 + $0x50] sm:$0xff]  ;;  %613 = vtanh.f32 %v852_v30  ;;  %v108_v39 = vld [vmem:[#allocation7 + $0x60] sm:$0xff]  ;;  %v253_v17 = vmul.f32 %v252_v15, %v852_v30  ;;  %p691_p0 = pnand %p690_p13, %p684_p10 }
  0x40   :  { %560 = vmatpush3.bf16.msra.mxu1 %v559_v13  ;;  %537 = vmatprep.subr.bf16.mxu0 %v740_v0  ;;  %v89_v36 = vld [vmem:[#allocation4 + $0x58] sm:$0xff]  ;;  %v547_v37 = vpack.c.bf16 %v107_v34, %v106_v33  ;;  %v109_v40 = vld [vmem:[#allocation7 + $0x68] sm:$0xff]  ;;  %v90_v41 = vld [vmem:[#allocation4 + $0x60] sm:$0xff] }
  0x41   :  { %561 = vmatprep.subr.bf16.mxu1 %v740_v0  ;;  %v571_v38 = vpack.c.bf16 %v89_v36, %v88_v35  ;;  %v91_v42 = vld [vmem:[#allocation4 + $0x68] sm:$0xff]  ;;  %v550_v43 = vpack.c.bf16 %v109_v40, %v108_v39  ;;  %v110_v45 = vld [vmem:[#allocation7 + $0x70] sm:$0xff]  ;;  %v111_v46 = vld [vmem:[#allocation7 + $0x78] sm:$0xff] }
  0x42   :  { %v574_v44 = vpack.c.bf16 %v91_v42, %v90_v41  ;;  %v92_v47 = vld [vmem:[#allocation4 + $0x70] sm:$0xff]  ;;  %v93_v48 = vld [vmem:[#allocation4 + $0x78] sm:$0xff]  ;;  %v553_v50 = vpack.c.bf16 %v111_v46, %v110_v45  ;;  %v258_v52 = vld [vmem:[#allocation9] sm:$0xff] }
  0x43   :  { %539 = vmatpush3.bf16.msra.mxu0 %v538_v18  ;;  %v577_v51 = vpack.c.bf16 %v93_v48, %v92_v47  ;;  %v259_v53 = vld [vmem:[#allocation9 + $0x8] sm:$0xff]  ;;  %v77_v56 = vld [vmem:[%s908_s4] sm:$0xff]  ;;  %v260_v57 = vld [vmem:[#allocation9 + $0x10] sm:$0xff] }
  0x44   :  { %563 = vmatpush3.bf16.msra.mxu1 %v562_v19  ;;  %540 = vmatprep.subr.bf16.mxu0 %v740_v0  ;;  %v580_v55 = vpack.c.bf16 %v259_v53, %v258_v52  ;;  %v261_v58 = vld [vmem:[#allocation9 + $0x18] sm:$0xff]  ;;  %v262_v60 = vld [vmem:[#allocation9 + $0x20] sm:$0xff]  ;;  %v263_v61 = vld [vmem:[#allocation9 + $0x28] sm:$0xff] }
  0x45   :  { %564 = vmatprep.subr.bf16.mxu1 %v740_v0  ;;  %v583_v59 = vpack.c.bf16 %v261_v58, %v260_v57  ;;  %v586_v62 = vpack.c.bf16 %v263_v61, %v262_v60  ;;  %v264_v63 = vld [vmem:[#allocation9 + $0x30] sm:$0xff]  ;;  %v265_v2 = vld [vmem:[#allocation9 + $0x38] sm:$0xff]  ;;  %v266_v4 = vld [vmem:[#allocation9 + $0x40] sm:$0xff] }
  0x46   :  { %v589_v3 = vpack.c.bf16 %v265_v2, %v264_v63  ;;  %v267_v5 = vld [vmem:[#allocation9 + $0x48] sm:$0xff]  ;;  %v269_v7 = vld [vmem:[#allocation9 + $0x58] sm:$0xff]  ;;  %v270_v9 = vld [vmem:[#allocation9 + $0x60] sm:$0xff] }
  0x47   :  { %542 = vmatpush3.bf16.msra.mxu0 %v541_v24  ;;  %v592_v6 = vpack.c.bf16 %v267_v5, %v266_v4  ;;  %v271_v10 = vld [vmem:[#allocation9 + $0x68] sm:$0xff]  ;;  %v272_v12 = vld [vmem:[#allocation9 + $0x70] sm:$0xff]  ;;  %v273_v13 = vld [vmem:[#allocation9 + $0x78] sm:$0xff] }
  0x48   :  { %566 = vmatpush3.bf16.msra.mxu1 %v565_v25  ;;  %543 = vmatprep.subr.bf16.mxu0 %v740_v0  ;;  %v598_v11 = vpack.c.bf16 %v271_v10, %v270_v9  ;;  %v601_v14 = vpack.c.bf16 %v273_v13, %v272_v12 }
  0x49   :  { %567 = vmatprep.subr.bf16.mxu1 %v740_v0  ;;  %v614_v49 = vpop.eup %613 }
  0x4a   :  { %v95_v54 = vadd.f32 1.0, %v614_v49 }
  0x4b   :  { %545 = vmatpush3.bf16.msra.mxu0 %v544_v31 }
  0x4c   :  { %569 = vmatpush3.bf16.msra.mxu1 %v568_v32  ;;  %546 = vmatprep.subr.bf16.mxu0 %v740_v0 }
  0x4d   :  { %570 = vmatprep.subr.bf16.mxu1 %v740_v0 }
  0x4f   :  { %548 = vmatpush3.bf16.msra.mxu0 %v547_v37 }
  0x50   :  { %572 = vmatpush3.bf16.msra.mxu1 %v571_v38  ;;  %549 = vmatprep.subr.bf16.mxu0 %v740_v0 }
  0x51   :  { %573 = vmatprep.subr.bf16.mxu1 %v740_v0 }
  0x53   :  { %551 = vmatpush3.bf16.msra.mxu0 %v550_v43 }
  0x54   :  { %575 = vmatpush3.bf16.msra.mxu1 %v574_v44  ;;  %552 = vmatprep.subr.bf16.mxu0 %v740_v0 }
  0x55   :  { %576 = vmatprep.subr.bf16.mxu1 %v740_v0 }
  0x57   :  { %554 = vmatpush3.bf16.msra.mxu0 %v553_v50 }
  0x58   :  { %578 = vmatpush3.bf16.msra.mxu1 %v577_v51  ;;  %579 = vmatprep.subr.bf16.mxu0 %v740_v0 }
  0x5a   :  { %459 = vmatmul.mubr.f32.vlgmr.msra.gmra.mrb[0].mxu0 %v95_v54 }
  0x5b   :  { %494 = vmatmul.mubr.f32.vlgmr.msra.gmra.mrb[0].mxu1 %v77_v56  ;;  %581 = vmatpush3.bf16.msra.mxu0 %v580_v55 }
  0x5c   :  { %582 = vmatprep.subr.bf16.mxu0 %v740_v0  ;;  %528 = vmatprep.mubr.msk.f32.mxu0 %vm741_vm0, %v742_v1  ;;  %v268_v1 = vld [vmem:[#allocation9 + $0x50] sm:$0xff] }
  0x5d   :  { %v595_v8 = vpack.c.bf16 %v269_v7, %v268_v1 }
  0x5f   :  { %584 = vmatpush3.bf16.msra.mxu0 %v583_v59 }
  0x60   :  { %585 = vmatprep.subr.bf16.mxu0 %v740_v0 }
  0x63   :  { %587 = vmatpush3.bf16.msra.mxu0 %v586_v62 }
  0x64   :  { %588 = vmatprep.subr.bf16.mxu0 %v740_v0 }
  0x67   :  { %590 = vmatpush3.bf16.msra.mxu0 %v589_v3 }
  0x68   :  { %591 = vmatprep.subr.bf16.mxu0 %v740_v0 }
  0x6b   :  { %593 = vmatpush3.bf16.msra.mxu0 %v592_v6 }
  0x6c   :  { %594 = vmatprep.subr.bf16.mxu0 %v740_v0 }
  0x6f   :  { %596 = vmatpush3.bf16.msra.mxu0 %v595_v8 }
  0x70   :  { %597 = vmatprep.subr.bf16.mxu0 %v740_v0 }
  0x73   :  { %599 = vmatpush3.bf16.msra.mxu0 %v598_v11 }
  0x74   :  { %600 = vmatprep.subr.bf16.mxu0 %v740_v0 }
  0x77   :  { %602 = vmatpush3.bf16.msra.mxu0 %v601_v14 }
 0x12d   :  { %v178_v16 = vpop.f32.mrb[0].mxu0 }
 0x12e   :  { %v248_v18 = vpop.f32.mrb[0].mxu1  ;;  %v460_v19 = vpop.f32.mrb[1].mxu0 }
 0x12f   :  { %v249_v20 = vadd.f32 %v248_v18, %v178_v16  ;;  %v495_v21 = vpop.f32.mrb[1].mxu1 }
 0x131   :  { %v254_v22 = vadd.f32 %v253_v17, %v249_v20 }
 0x133   :  { %615 = vtanh.f32 %v254_v22  ;;  %256 = vst [vmem:[#allocation11] sm:$0xff] %v254_v22 }
 0x13d   :  { %v616_v23 = vpop.eup %615 }
 0x13e   :  { %529 = vmatmul.mubr.f32.vlgmr.msra.gmra.mrb[2].mxu0 %v616_v23 }
 0x13f   :  { %694 = shalt.err (!%p691_p0)
}
 0x140   :  { %s695_s21 = scalar_lea.hbm %s911_s7, 128 }
 0x141   :  { %p696_p1 = scmp.ne.s32.totalorder %s911_s7, %s695_s21  ;;  %p699_p2 = scmp.lt.u32.totalorder %s695_s21, %s911_s7 }
 0x143   :  { %p701_p3 = pnand %p699_p2, %p696_p1 }
 0x145   :  { %704 = shalt.err (!%p701_p3)
}
 0x146   :  { %364 = dma.vmem_to_hbm [thread:$0]  %s362_s18, 128, %s911_s7, [#allocation12]  }
 0x147   :  { %s744_s28 = smov [#allocation10]  }
 0x148   :  { %s351_s29 = sshll.u32 %s744_s28, 4  ;;  %s352_s29 = int_to_ptr.vmem [resolvable:$true] %s351_s29 }
 0x149   :  { %s705_s30 = scalar_lea.vmem %s352_s29, 128  ;;  %p710_p5 = scmp.lt.s32.totalorder %s352_s29, %s352_s29 }
 0x14a   :  { %p706_p4 = scmp.ne.s32.totalorder %s352_s29, %s705_s30  ;;  %p711_p6 = scmp.lt.s32.totalorder %s705_s30, %s705_s30 }
 0x14c   :  { %p712_p7 = por %p711_p6, %p710_p5 }
 0x14e   :  { %p713_p8 = pnand %p712_p7, %p706_p4 }
 0x211   :  { %v340_v0 = vpop.f32.mrb[2].mxu0 }
 0x212   :  { %344 = vst [vmem:[#allocation10] sm:$0xff] %v340_v0  ;;  %v530_v24 = vpop.f32.mrb[3].mxu0 }
 0x213   :  { %716 = shalt.err (!%p713_p8)
}
 0x214   :  { %s717_s10 = scalar_lea.hbm %s910_s6, 128 }
 0x215   :  { %p718_p9 = scmp.ne.s32.totalorder %s910_s6, %s717_s10  ;;  %p721_p10 = scmp.lt.u32.totalorder %s717_s10, %s910_s6 }
 0x217   :  { %p723_p11 = pnand %p721_p10, %p718_p9 }
 0x219   :  { %726 = shalt.err (!%p723_p11)
}
 0x21a   :  { %354 = dma.vmem_to_hbm [thread:$0]  %s352_s29, 128, %s910_s6, [#allocation6]  }
 0x21b   :  { %731 = dma.done.wait [#allocation6], 128  }
 0x21c   :  { %732 = vsyncadd [#allocation6], 4294967168 }
 0x21d   :  { %733 = dma.done.wait [#allocation12], 128  }
 0x21e   :  { %734 = vsyncadd [#allocation12], 4294967168 }
 0x21f   :  { %371 = vsyncpa [#allocation5], 1 }
 0x220   :  { %372 = vsyncpa [#allocation8], 1 }
 0x221   :  { %373 = vsyncpa [#allocation6], 1 }
 0x222   :  { %374 = vsyncpa [#allocation12], 1 }

</bundles_post_ra>
